<compile_context>
chip_gen: v7x
topology: tpu7x:2x2x1
jax: 0.10.0
libtpu: 0.0.40
codegen_flags: <defaults>
</compile_context>

<pallas_src>
import jax
import jax.numpy as jnp
from jax.experimental import pallas as pl
from jax.experimental.pallas import tpu as pltpu


def attn_pool_kernel(x_ref, w_ref, o_ref):
    # x_ref: (Bn, T, H) in native dtype; w_ref: (1, H); o_ref: (Bn, H)
    x = x_ref[...]                                   # (Bn, T, H), no f32 up-cast
    w = w_ref[0]                                     # (H,)

    # Attention scores: elementwise multiply (VPU) + lane reduce (XLU).
    # Bias omitted: softmax over T is invariant to a shared scalar shift.
    scores = jnp.sum((x * w).astype(jnp.float32), axis=-1)        # (Bn, T) f32

    # Numerically stable softmax over the sequence axis.
    m = jnp.max(scores, axis=-1, keepdims=True)                   # (Bn, 1)
    e = jnp.exp(scores - m)                                       # (Bn, T)
    inv = pl.reciprocal(jnp.sum(e, axis=-1, keepdims=True), approx=True)
    att = e * inv                                                 # (Bn, T)

    # Weighted sum over T on the MXU with f32 accumulation (batched matmul,
    # same pattern as flash-attention's 'bqk,bkd->bqd').
    pooled = jnp.einsum(
        "bqt,bth->bqh",
        att.astype(x.dtype)[:, None, :],                          # (Bn, 1, T)
        x,                                                        # (Bn, T, H)
        preferred_element_type=jnp.float32,
    )                                                             # (Bn, 1, H)
    o_ref[...] = pooled[:, 0, :].astype(o_ref.dtype)


def attention_pooling(batch_rep, w, b=None, *, block_n=8):
    """batch_rep: (N, T, H); w: (1, H) [nn.Linear weight]; b ignored (cancels
    exactly inside the softmax). Returns (N, H)."""
    N, T, H = batch_rep.shape
    w2 = jnp.asarray(w).reshape(1, H)

    # Bn rows per grid step (multiple of 8 when possible); pad N if needed.
    bn = min(block_n, N)
    n_blocks = -(-N // bn)
    n_pad = n_blocks * bn
    x = batch_rep
    if n_pad != N:
        x = jnp.pad(x, ((0, n_pad - N), (0, 0), (0, 0)))

    out = pl.pallas_call(
        attn_pool_kernel,
        out_shape=jax.ShapeDtypeStruct((n_pad, H), batch_rep.dtype),
        grid_spec=pltpu.PrefetchScalarGridSpec(
            num_scalar_prefetch=0,
            grid=(n_blocks,),
            in_specs=[
                pl.BlockSpec((bn, T, H), lambda i: (i, 0, 0)),  # Bn batch rows
                pl.BlockSpec((1, H), lambda i: (0, 0)),         # lane-dense weight
            ],
            out_specs=pl.BlockSpec((bn, H), lambda i: (i, 0)),
        ),
        compiler_params=pltpu.CompilerParams(
            dimension_semantics=("parallel",),
        ),
    )(x, w2)
    return out[:N] if n_pad != N else out


def attention_pooling_ref(batch_rep, w, b):
    # Pure-JAX reference with the bias included (proves it is a no-op).
    scores = jnp.einsum("nth,oh->nto", batch_rep, w) + b          # (N, T, 1)
    att = jax.nn.softmax(scores[..., 0], axis=1)[..., None]       # (N, T, 1)
    return jnp.sum(batch_rep * att, axis=1)                       # (N, H)


if __name__ == "__main__":
    N, T, H = 16, 8, 128
    key = jax.random.PRNGKey(0)
    kx, kw, kb = jax.random.split(key, 3)

    x = jax.random.normal(kx, (N, T, H), dtype=jnp.float32)
    # nn.Linear(input_dim, 1): weight (1, H), bias (1).
    bound = 1.0 / (H ** 0.5)
    w = jax.random.uniform(kw, (1, H), minval=-bound, maxval=bound, dtype=jnp.float32)
    b = jax.random.uniform(kb, (1,), minval=-bound, maxval=bound, dtype=jnp.float32)

    out = attention_pooling(x, w, b)
    out = jax.block_until_ready(out)

    ref = attention_pooling_ref(x, w, b)
    assert out.shape == (N, H)
    # Slightly loose tolerance: softmax normalizer uses the EUP approx reciprocal.
    assert jnp.allclose(out, ref, atol=2e-3, rtol=2e-3), (out, ref)
    print("KERNEL_OK")
</pallas_src>

<mosaic_0001>
module attributes {stable_mosaic.version = 11 : i64} {
  func.func @attn_pool_kernel(%arg0: i32, %arg1: memref<8x8x128xf32, #tpu.memory_space<vmem>>, %arg2: memref<1x128xf32, #tpu.memory_space<vmem>>, %arg3: memref<8x128xf32, #tpu.memory_space<vmem>>) attributes {dimension_semantics = [#tpu.dimension_semantics<parallel>], iteration_bounds = array<i64: 2>, scalar_prefetch = 0 : i64, scratch_operands = 0 : i64, tpu.core_type = #tpu.core_type<tc>, window_params = [{transform_indices = @transform_0, window_bounds = array<i64: 8, 8, 128>}, {pipeline_mode = #tpu.pipeline_mode<synchronous>, transform_indices = @transform_1, window_bounds = array<i64: 1, 128>}, {transform_indices = @transform_2, window_bounds = array<i64: 8, 128>}]} {
    %c0 = arith.constant 0 : index
    %c0_0 = arith.constant 0 : index
    %c0_1 = arith.constant 0 : index
    %0 = vector.load %arg1[%c0, %c0_0, %c0_1] : memref<8x8x128xf32, #tpu.memory_space<vmem>>, vector<8x8x128xf32>
    %c0_2 = arith.constant 0 : index
    %c0_3 = arith.constant 0 : index
    %1 = vector.load %arg2[%c0_2, %c0_3] : memref<1x128xf32, #tpu.memory_space<vmem>>, vector<1x128xf32>
    %2 = vector.shape_cast %1 : vector<1x128xf32> to vector<128xf32>
    %3 = vector.shape_cast %2 : vector<128xf32> to vector<1x1x128xf32>
    %4 = vector.broadcast %3 : vector<1x1x128xf32> to vector<8x8x128xf32>
    %5 = arith.mulf %0, %4 : vector<8x8x128xf32>
    %cst = arith.constant dense<0.000000e+00> : vector<8x8xf32>
    %6 = vector.multi_reduction <add>, %5, %cst [2] : vector<8x8x128xf32> to vector<8x8xf32>
    %cst_4 = arith.constant dense<0xFF800000> : vector<8xf32>
    %7 = vector.multi_reduction <maximumf>, %6, %cst_4 [1] : vector<8x8xf32> to vector<8xf32>
    %8 = vector.shape_cast %7 : vector<8xf32> to vector<8x1xf32>
    %9 = vector.broadcast %8 : vector<8x1xf32> to vector<8x8xf32>
    %10 = arith.subf %6, %9 : vector<8x8xf32>
    %11 = math.exp %10 : vector<8x8xf32>
    %cst_5 = arith.constant dense<0.000000e+00> : vector<8xf32>
    %12 = vector.multi_reduction <add>, %11, %cst_5 [1] : vector<8x8xf32> to vector<8xf32>
    %13 = vector.shape_cast %12 : vector<8xf32> to vector<8x1xf32>
    %14 = tpu.reciprocal %13 {approx = true} : vector<8x1xf32> -> vector<8x1xf32>
    %15 = vector.broadcast %14 : vector<8x1xf32> to vector<8x8xf32>
    %16 = arith.mulf %11, %15 : vector<8x8xf32>
    %17 = vector.shape_cast %16 : vector<8x8xf32> to vector<8x1x8xf32>
    "tpu.trace_start"() <{level = 10 : i32, message = "bqt,bth->bqh"}> : () -> ()
    %cst_6 = arith.constant dense<0.000000e+00> : vector<8x1x128xf32>
    %18 = tpu.matmul %17, %0, %cst_6 {dimension_numbers = #tpu.dot_dimension_numbers<[2], [1], [1], [2], [0, 0, 0, 1, 1, 2], [0], [0]>} : vector<8x1x8xf32>, vector<8x8x128xf32>, vector<8x1x128xf32> -> vector<8x1x128xf32>
    "tpu.trace_stop"() : () -> ()
    %19 = vector.shape_cast %18 : vector<8x1x128xf32> to vector<8x128xf32>
    %c0_7 = arith.constant 0 : index
    %c0_8 = arith.constant 0 : index
    %20 = vector.load %arg3[%c0_7, %c0_8] : memref<8x128xf32, #tpu.memory_space<vmem>>, vector<8x128xf32>
    tpu.vector_store %arg3[%c0_7, %c0_8], %19 {strides = array<i32>} : memref<8x128xf32, #tpu.memory_space<vmem>>, vector<8x128xf32>,
    return
  }
  func.func @transform_0(%arg0: i32) -> (i32, i32, i32) {
    %c0_i32 = arith.constant 0 : i32
    %c0_i32_0 = arith.constant 0 : i32
    %c0_i32_1 = arith.constant 0 : i32
    return %arg0, %c0_i32, %c0_i32_0 : i32, i32, i32
  }
  func.func @transform_1(%arg0: i32) -> (i32, i32) {
    %c0_i32 = arith.constant 0 : i32
    %c0_i32_0 = arith.constant 0 : i32
    %c0_i32_1 = arith.constant 0 : i32
    return %c0_i32, %c0_i32_0 : i32, i32
  }
  func.func @transform_2(%arg0: i32) -> (i32, i32) {
    %c0_i32 = arith.constant 0 : i32
    %c0_i32_0 = arith.constant 0 : i32
    return %arg0, %c0_i32 : i32, i32
  }
}

</mosaic_0001>

<bundles_post_ra>
// kernel: tpu_custom_call.1
= control target key start
LH: loop header
LB: loop body
LE: loop exit
PB: predicated region body
PF: predicated region fallthrough
CT: control target
= control target key end

     0   :  { %7 = vsyncpa [#allocation3], 0  ;;  %s1795_s0 = inlined_call_operand.hbm [shape: f32[16,8,128], index: 0, kind: input, shape index: {}]   ;;  %s1796_s1 = inlined_call_operand.vmem [shape: f32[1,128], index: 1, kind: input, shape index: {}]   ;;  %s1797_s2 = inlined_call_operand.hbm [shape: f32[16,128], index: 2, kind: output, shape index: {}]  }
   0x1   :  { %9 = vsyncpa [#allocation3 + $0x1], 0 }
   0x2   :  { %10 = vsyncpa [#allocation4], 0 }
   0x3   :  { %12 = vsyncpa [#allocation4 + $0x1], 0  ;;  %s1471_s9 = smov 0   ;;  %s1473_s10 = smov 0  }
   0x4   :  { %s1475_s11 = smov 0   ;;  %s1477_s12 = smov 0  }
   0x5 LB: > { %s1492_s13 = sadd.s32 4294967295, %s1447_s12   ;;  %s1201_s14 = sadd.s32 4294967294, %s1447_s12   ;;  %s1447_s12 = sphi %s1477_s12, %s1810_s12   ;;  %s1443_s11 = sphi %s1475_s11, %s1809_s11   ;;  %s1439_s10 = sphi %s1473_s10, %s1808_s10   ;;  %s1435_s9 = sphi %s1471_s9, %s1807_s9  }
   0x6   : > { %s1496_s15 = sadd.s32 1, %s1447_s12   ;;  %s25_s16 = sadd.s32 1, %s1443_s11 }
   0x7   : > { %s22_s17 = ssub.s32 %s1447_s12, %s1496_s15  ;;  %p32_p0 = scmp.ne.s32.totalorder %s1443_s11, %s1439_s10 }
   0x8   : > { %p23_p1 = scmp.eq.s32.totalorder %s22_s17, 0  ;;  %p33_p2 = scmp.eq.s32.totalorder %s1447_s12, 0 }
   0x9   : > { %p38_p3 = scmp.ne.s32.totalorder %s1439_s10, %s1435_s9  ;;  %p39_p4 = scmp.eq.s32.totalorder %s1492_s13, 0 }
   0xa   : > { %s1508_s18 = scalar_select %p23_p1, %s1443_s11, %s25_s16  }
   0xb   : > { %p1510_p5 = por %p33_p2, %p32_p0  ;;  %p1514_p6 = por %p39_p4, %p38_p3 }
   0xc   : > { %p83_p7 = scmp.eq.s32.totalorder %s1492_s13, 1  ;;  %p89_p8 = scmp.eq.s32.totalorder %s1201_s14, 1 }
   0xd   : > { %p1292_p10 = scmp.lt.s32.totalorder %s1447_s12, 2  ;;  %s112_s23 = sand.u32 1, %s1443_s11  }
   0xe   : > { %p1521_p11 = por %p83_p7, %p32_p0  ;;  %p1525_p12 = por %p89_p8, %p38_p3 }
   0xf   : > { %s1223_s24 = sshll.u32 %s1447_s12, 10  ;;  %s1204_s25 = sshll.u32 %s112_s23, 6 }
  0x10   : > { %s1801_s21 = scalar_select %p1521_p11, 1, 0 }
  0x11   : > { %s1802_s22 = scalar_select %p1525_p12, 1, 0 }
  0x12   : > { %s1534_s28 = scalar_lea.hbm %s1795_s0, %s1223_s24  ;;  %s116_s29 = scalar_lea.vmem [#allocation2], %s1204_s25 }
  0x13   : > { %s123_s30 = sshll.u32 %s116_s29, 4  ;;  %p1538_p13 = pnand %p1292_p10, %p1510_p5  ;;  %s1542_s30 = int_to_ptr.vmem [resolvable:$true] %s123_s30 }
  0x14   : > { %s1544_s4 = scalar_lea.sflag [#allocation3], %s112_s23  ;;  %s1351_s5 = scalar_lea.hbm %s1534_s28, 1024 }
  0x15   : > { %p1352_p0 = scmp.ne.s32.totalorder %s1534_s28, %s1351_s5  ;;  %p1353_p1 = pneg %p1538_p13 }
  0x16   : > { %s1356_s8 = scalar_lea.hbm %s1795_s0, 2048  ;;  %p1357_p4 = scmp.lt.u32.totalorder %s1534_s28, %s1795_s0 }
  0x17   : > { %p1354_p2 = pnand %p1353_p1, %p1352_p0  ;;  %p1358_p5 = scmp.lt.u32.totalorder %s1356_s8, %s1351_s5 }
  0x18   : > { %p1360_p8 = scmp.lt.u32.totalorder %s1351_s5, %s1534_s28 }
  0x19   : > { %p1355_p3 = pneg %p1354_p2  ;;  %p1359_p7 = por %p1358_p5, %p1357_p4 }
  0x1b   : > { %p1361_p10 = por %p1360_p8, %p1359_p7 }
  0x1d   : > { %p1362_p9 = pnand %p1361_p10, %p1355_p3 }
  0x1f   : > { %1365 = shalt.err (!%p1362_p9)
}
  0x20   : > { %s1366_s17 = scalar_lea.vmem %s1542_s30, 1024  ;;  %s1449_s19 = smov [#allocation2]  }
  0x21   : > { %p1367_p0 = scmp.ne.s32.totalorder %s1542_s30, %s1366_s17  ;;  %s1371_s23 = sshll.u32 %s1449_s19, 4  ;;  %s1372_s23 = int_to_ptr.vmem [resolvable:$false] %s1371_s23 }
  0x22   : > { %s1373_s24 = scalar_lea.vmem %s1372_s23, 2048  ;;  %p1374_p11 = scmp.lt.s32.totalorder %s1542_s30, %s1372_s23 }
  0x23   : > { %p1369_p2 = pnand %p1367_p0, %p1353_p1  ;;  %p1375_p4 = scmp.lt.s32.totalorder %s1373_s24, %s1366_s17 }
  0x25   : > { %p1370_p12 = pneg %p1369_p2  ;;  %p1376_p5 = por %p1375_p4, %p1374_p11 }
  0x27   : > { %p1377_p7 = pnand %p1376_p5, %p1370_p12 }
  0x29   : > { %1380 = shalt.err (!%p1377_p7)
}
  0x2a   : > { %s1450_s25 = smov 128   ;;  %s1451_s26 = smov 8  }
  0x2b   : > { %1287 = dma.hbm_to_vmem [thread:$0]  (!%p1538_p13), %s1534_s28, 1024, %s1542_s30, %s1544_s4, %s1450_s25, %s1450_s25, %s1451_s26  }
  0x2c   : > { %p1207_p9 = scmp.ge.s32.totalorder %s1447_s12, 1  ;;  %p131_p1 = scmp.lt.s32.totalorder %s1447_s12, 3 }
  0x2e   : > { %p132_p3 = pnand %p1207_p9, %p131_p1 }
  0x2f   : > { %s1575_s27 = sand.u32 (!%p132_p3), 1, %s1439_s10  }
  0x30   : > { %135 = sbr.rel (%p132_p3) target bundleno = 1078 (0x436), region = 28  ;;  %s1208_s29 = sshll.u32 (!%p132_p3), %s1575_s27, 6 }
  0x31   : > { %s138_s5 = scalar_lea.sflag (!%p132_p3), [#allocation3], %s1575_s27  ;;  %s141_s6 = scalar_lea.vmem (!%p132_p3), [#allocation2], %s1208_s29 }
  0x37   : > { %1426 = dma.done.wait (%p1514_p6), %s138_s5, 1024  }
  0x38   : > { %1428 = vsyncadd (%p1514_p6), %s138_s5, 4294966272  ;;  %v1583_v0 = vld [vmem:[%s141_s6] sm:$0xff]  ;;  %v1588_v2 = vld [vmem:[%s141_s6 + $0x10] sm:$0xff]  ;;  %v210_v17 = vlaneseq  ;;  %vm244_vm0 = vcmask 1041409   ;;  %vm246_vm1 = vcmask 1042434   ;;  %vm248_vm2 = vcmask 1043459  }
  0x39   : > { %v1210_v1 = vld [vmem:[%s1796_s1] ss:$0 sm:$0xff]  ;;  %v1592_v5 = vld [vmem:[%s141_s6 + $0x8] sm:$0xff]  ;;  %v1594_v6 = vld [vmem:[%s141_s6 + $0x18] sm:$0xff]  ;;  %vm250_vm3 = vcmask 1044484   ;;  %vm252_vm4 = vcmask 1045509  }
  0x3a   : > { %v178_v3 = vmul.f32 %v1210_v1, %v1583_v0  ;;  %v180_v4 = vmul.f32 %v1210_v1, %v1588_v2  ;;  %v179_v7 = vmul.f32 %v1210_v1, %v1592_v5  ;;  %v181_v8 = vmul.f32 %v1210_v1, %v1594_v6  ;;  %v1598_v9 = vld [vmem:[%s141_s6 + $0x20] sm:$0xff]  ;;  %v1600_v10 = vld [vmem:[%s141_s6 + $0x28] sm:$0xff]  ;;  %v1604_v13 = vld [vmem:[%s141_s6 + $0x30] sm:$0xff]  ;;  %s1209_s20 = sshll.u32 %s1575_s27, 3  ;;  %s1220_s3 = sshll.u32 %s1492_s13, 7 }
  0x3b   : > { %v182_v11 = vmul.f32 %v1210_v1, %v1598_v9  ;;  %v183_v12 = vmul.f32 %v1210_v1, %v1600_v10  ;;  %v1606_v14 = vld [vmem:[%s141_s6 + $0x38] sm:$0xff]  ;;  %v184_v15 = vmul.f32 %v1210_v1, %v1604_v13  ;;  %v211_v18 = vand.u32 127, %v210_v17  ;;  %s161_s4 = scalar_lea.vmem [#allocation5], %s1209_s20  ;;  %s1750_s16 = scalar_lea.hbm %s1797_s2, %s1220_s3 }
  0x3c   : > { %186 = vadd.xlane.f32.xlu0 %v178_v3  ;;  %190 = vadd.xlane.f32.xlu1 %v180_v4  ;;  %v185_v16 = vmul.f32 %v1210_v1, %v1606_v14  ;;  %v1610_v19 = vshrl.u32 %v210_v17, 7  ;;  %vm254_vm5 = vcmask 1046534   ;;  %vm256_vm6 = vcmask 1047559   ;;  %s1131_s7 = sshll.u32 %s161_s4, 4  ;;  %s1118_s17 = scalar_lea.sflag [#allocation4], %s1575_s27  ;;  %s1752_s7 = int_to_ptr.vmem [resolvable:$true] %s1131_s7 }
  0x3d   : > { %vm259_vm7 = vcmask 64512   ;;  %v1452_v45 = vmov 0   ;;  %vm1454_vm8 = vmmov 0   ;;  %s1381_s13 = scalar_lea.vmem %s1752_s7, 128  ;;  %p1804_p11 = scmp.ne.s32.totalorder %s1801_s21, 0 }
  0x3e   : > { %v1613_v22 = vsub.s32 %v211_v18, %v1610_v19  ;;  %1332 = vset.pattern.permute.xlu0 %v1452_v45  ;;  %1331 = vset.pattern.permute.xlu1 %v1452_v45  ;;  %v266_v46 = vsub.s32 0, %v1610_v19  ;;  %v270_v47 = vsub.s32 1, %v1610_v19  ;;  %v274_v48 = vsub.s32 2, %v1610_v19  ;;  %p1382_p6 = scmp.ne.s32.totalorder %s1752_s7, %s1381_s13  ;;  %s1455_s19 = smov [#allocation5]  }
  0x3f   : > { %v278_v49 = vsub.s32 3, %v1610_v19  ;;  %v282_v54 = vsub.s32 4, %v1610_v19  ;;  %v286_v61 = vsub.s32 5, %v1610_v19  ;;  %v290_v3 = vsub.s32 6, %v1610_v19  ;;  %s1385_s23 = sshll.u32 %s1455_s19, 4  ;;  %s1386_s23 = int_to_ptr.vmem [resolvable:$false] %s1385_s23 }
  0x40   : > { %188 = vadd.xlane.f32.xlu0 %v179_v7  ;;  %192 = vadd.xlane.f32.xlu1 %v181_v8  ;;  %p1383_p12 = pnand %p1382_p6, %p1804_p11  ;;  %s1387_s24 = scalar_lea.vmem %s1386_s23, 256 }
  0x41   : > { %p1388_p8 = scmp.lt.s32.totalorder %s1752_s7, %s1386_s23  ;;  %p1389_p10 = scmp.lt.s32.totalorder %s1387_s24, %s1381_s13 }
  0x42   : > { %p1384_p13 = pneg %p1383_p12 }
  0x43   : > { %p1390_p0 = por %p1389_p10, %p1388_p8 }
  0x44   : > { %194 = vadd.xlane.f32.xlu0 %v182_v11  ;;  %196 = vadd.xlane.f32.xlu1 %v183_v12  ;;  %v294_v11 = vsub.s32 7, %v1610_v19 }
  0x45   : > { %p1391_p2 = pnand %p1390_p0, %p1384_p13 }
  0x48   : > { %198 = vadd.xlane.f32.xlu0 %v184_v15  ;;  %200 = vadd.xlane.f32.xlu1 %v185_v16 }
  0xc9   : > { %v187_v20 = vpop.xlane.xlu0 %186  ;;  %v191_v21 = vpop.xlane.xlu1 %190 }
  0xca   : > { %v215_v25 = vrot.slane %v187_v20, %v1613_v22  ;;  %v223_v28 = vrot.slane %v191_v21, %v1613_v22 }
  0xcd   : > { %v189_v23 = vpop.xlane.xlu0 %188  ;;  %v193_v24 = vpop.xlane.xlu1 %192 }
  0xce   : > { %v219_v26 = vrot.slane %v189_v23, %v1613_v22  ;;  %v227_v27 = vrot.slane %v193_v24, %v1613_v22 }
  0xd0   : > { %v245_v29 = vsel %vm244_vm0, %v219_v26, %v215_v25 }
  0xd1   : > { %v247_v30 = vsel %vm246_vm1, %v223_v28, %v245_v29  ;;  %v195_v31 = vpop.xlane.xlu0 %194  ;;  %v197_v32 = vpop.xlane.xlu1 %196 }
  0xd2   : > { %v249_v33 = vsel %vm248_vm2, %v227_v27, %v247_v30  ;;  %v231_v34 = vrot.slane %v195_v31, %v1613_v22  ;;  %v235_v35 = vrot.slane %v197_v32, %v1613_v22 }
  0xd4   : > { %v251_v36 = vsel %vm250_vm3, %v231_v34, %v249_v33 }
  0xd5   : > { %v199_v37 = vpop.xlane.xlu0 %198  ;;  %v201_v38 = vpop.xlane.xlu1 %200  ;;  %v253_v41 = vsel %vm252_vm4, %v235_v35, %v251_v36 }
  0xd6   : > { %v239_v39 = vrot.slane %v199_v37, %v1613_v22  ;;  %v243_v40 = vrot.slane %v201_v38, %v1613_v22 }
  0xd8   : > { %v255_v42 = vsel %vm254_vm5, %v239_v39, %v253_v41 }
  0xd9   : > { %v257_v43 = vsel %vm256_vm6, %v243_v40, %v255_v42 }
  0xda   : > { %v260_v44 = vsel %vm259_vm7, %v257_v43, -inf }
  0xdb   : > { %261 = vmax.xlane.f32.xlu0 %v260_v44 }
 0x168   : > { %v262_v50 = vpop.xlane.xlu0 %261 }
 0x169   : > { %v267_v51 = vrot.slane %v262_v50, %v266_v46  ;;  %v271_v52 = vrot.slane %v262_v50, %v270_v47  ;;  %v275_v53 = vrot.slane %v262_v50, %v274_v48  ;;  %v279_v55 = vrot.slane %v262_v50, %v278_v49 }
 0x16a   : > { %v283_v62 = vrot.slane %v262_v50, %v282_v54  ;;  %v287_v4 = vrot.slane %v262_v50, %v286_v61  ;;  %v291_v12 = vrot.slane %v262_v50, %v290_v3 }
 0x16b   : > { %v304_v56 = vsub.f32 %v187_v20, %v267_v51  ;;  %v305_v57 = vsub.f32 %v189_v23, %v271_v52  ;;  %v306_v58 = vsub.f32 %v191_v21, %v275_v53  ;;  %v307_v63 = vsub.f32 %v193_v24, %v279_v55 }
 0x16c   : > { %v308_v7 = vsub.f32 %v195_v31, %v283_v62  ;;  %v309_v15 = vsub.f32 %v197_v32, %v287_v4  ;;  %v295_v20 = vrot.slane %v262_v50, %v294_v11  ;;  %v310_v21 = vsub.f32 %v199_v37, %v291_v12 }
 0x16d   : > { %v312_v59 = vmul.f32 1.442695, %v304_v56  ;;  %v314_v60 = vmul.f32 1.442695, %v305_v57  ;;  %v316_v1 = vmul.f32 1.442695, %v306_v58 }
 0x16e   : > { %v318_v8 = vmul.f32 1.442695, %v307_v63  ;;  %v320_v16 = vmul.f32 1.442695, %v308_v7  ;;  %v322_v23 = vmul.f32 1.442695, %v309_v15  ;;  %v311_v25 = vsub.f32 %v201_v38, %v295_v20 }
 0x16f   : > { %1333 = vpow2.f32 %v312_v59  ;;  %v324_v26 = vmul.f32 1.442695, %v310_v21  ;;  %v1453_v12 = vmov 0.0  }
 0x170   : > { %1335 = vpow2.f32 %v314_v60  ;;  %v326_v28 = vmul.f32 1.442695, %v311_v25  ;;  %1240 = vmatprep.subr.mxu0 %v1453_v12  ;;  %1242 = vmatprep.mubr.msk.f32.mxu0 %vm1454_vm8, %v1453_v12 }
 0x171   : > { %1337 = vpow2.f32 %v316_v1  ;;  %1241 = vmatpush3.msra.mxu0 %v1583_v0  ;;  %1245 = vmatprep.subr.mxu1 %v1453_v12 }
 0x172   : > { %1339 = vpow2.f32 %v318_v8  ;;  %1246 = vmatpush3.msra.mxu1 %v1592_v5  ;;  %1247 = vmatprep.mubr.msk.f32.mxu1 %vm1454_vm8, %v1453_v12 }
 0x173   : > { %1341 = vpow2.f32 %v320_v16  ;;  %1250 = vmatprep.subr.mxu0 %v1453_v12  ;;  %1255 = vmatprep.subr.mxu1 %v1453_v12 }
 0x174   : > { %1343 = vpow2.f32 %v322_v23 }
 0x175   : > { %1345 = vpow2.f32 %v324_v26 }
 0x176   : > { %1347 = vpow2.f32 %v326_v28 }
 0x179   : > { %v1334_v17 = vpop.eup %1333 }
 0x17a   : > { %v1336_v18 = vpop.eup %1335  ;;  %337 = vperm.xlu1 %1331, %v1334_v17  }
 0x17b   : > { %340 = vperm.xlu0 %1332, %v1336_v18   ;;  %v1655_v24 = vpop.eup %1337 }
 0x17c   : > { %v1340_v27 = vpop.eup %1339 }
 0x17d   : > { %v1342_v29 = vpop.eup %1341 }
 0x17e   : > { %343 = vperm.xlu1 %1331, %v1655_v24   ;;  %v1344_v30 = vpop.eup %1343 }
 0x17f   : > { %v1346_v31 = vpop.eup %1345 }
 0x180   : > { %v1348_v32 = vpop.eup %1347 }
 0x182   : > { %346 = vperm.xlu1 %1331, %v1340_v27  }
 0x186   : > { %349 = vperm.xlu1 %1331, %v1342_v29  }
 0x18a   : > { %352 = vperm.xlu1 %1331, %v1344_v30  }
 0x18e   : > { %355 = vperm.xlu1 %1331, %v1346_v31  }
 0x192   : > { %358 = vperm.xlu1 %1331, %v1348_v32  }
 0x1f9   : > { %v338_v33 = vpop.permute.xlu1 %337 }
 0x1fa   : > { %v341_v37 = vpop.permute.xlu0 %340  ;;  %v363_v40 = vrot.slane %v338_v33, %v1613_v22 }
 0x1fb   : > { %v367_v39 = vrot.slane %v341_v37, %v1613_v22 }
 0x1fd   : > { %v344_v34 = vpop.permute.xlu1 %343  ;;  %v392_v45 = vsel %vm244_vm0, %v367_v39, %v363_v40 }
 0x1fe   : > { %v371_v41 = vrot.slane %v344_v34, %v1613_v22 }
 0x200   : > { %v393_v51 = vsel %vm246_vm1, %v371_v41, %v392_v45 }
 0x201   : > { %v347_v35 = vpop.permute.xlu1 %346 }
 0x202   : > { %v375_v42 = vrot.slane %v347_v35, %v1613_v22 }
 0x204   : > { %v394_v53 = vsel %vm248_vm2, %v375_v42, %v393_v51 }
 0x205   : > { %v350_v36 = vpop.permute.xlu1 %349 }
 0x206   : > { %v379_v43 = vrot.slane %v350_v36, %v1613_v22 }
 0x208   : > { %v395_v55 = vsel %vm250_vm3, %v379_v43, %v394_v53 }
 0x209   : > { %v353_v38 = vpop.permute.xlu1 %352 }
 0x20a   : > { %v383_v50 = vrot.slane %v353_v38, %v1613_v22 }
 0x20c   : > { %v396_v57 = vsel %vm252_vm4, %v383_v50, %v395_v55 }
 0x20d   : > { %v356_v44 = vpop.permute.xlu1 %355 }
 0x20e   : > { %v387_v52 = vrot.slane %v356_v44, %v1613_v22 }
 0x210   : > { %v397_v59 = vsel %vm254_vm5, %v387_v52, %v396_v57 }
 0x211   : > { %v359_v56 = vpop.permute.xlu1 %358 }
 0x212   : > { %v391_v58 = vrot.slane %v359_v56, %v1613_v22 }
 0x214   : > { %v398_v60 = vsel %vm256_vm6, %v391_v58, %v397_v59 }
 0x215   : > { %v400_v62 = vsel %vm259_vm7, %v398_v60, 0.0 }
 0x216   : > { %401 = vadd.xlane.f32.xlu1 %v400_v62 }
 0x2a3   : > { %v402_v63 = vpop.xlane.xlu1 %401 }
 0x2a4   : > { %1349 = vrcp.f32 %v402_v63 }
 0x2ae   : > { %v1350_v1 = vpop.eup %1349 }
 0x2af   : > { %v408_v4 = vrot.slane %v1350_v1, %v266_v46  ;;  %v412_v8 = vrot.slane %v1350_v1, %v270_v47  ;;  %v416_v16 = vrot.slane %v1350_v1, %v274_v48  ;;  %v420_v47 = vrot.slane %v1350_v1, %v278_v49 }
 0x2b0   : > { %v424_v0 = vrot.slane %v1350_v1, %v282_v54  ;;  %v432_v20 = vrot.slane %v1350_v1, %v290_v3  ;;  %v436_v49 = vrot.slane %v1350_v1, %v294_v11 }
 0x2b1   : > { %v445_v7 = vmul.f32 %v1334_v17, %v408_v4  ;;  %v446_v15 = vmul.f32 %v1336_v18, %v412_v8  ;;  %v447_v46 = vmul.f32 %v1655_v24, %v416_v16  ;;  %v448_v48 = vmul.f32 %v1340_v27, %v420_v47 }
 0x2b2   : > { %v449_v5 = vmul.f32 %v1342_v29, %v424_v0  ;;  %v428_v17 = vrot.slane %v1350_v1, %v286_v61  ;;  %v451_v21 = vmul.f32 %v1346_v31, %v432_v20  ;;  %v452_v23 = vmul.f32 %v1348_v32, %v436_v49 }
 0x2b3   : > { %455 = vperm.xlu0 %1332, %v445_v7  }
 0x2b4   : > { %v450_v18 = vmul.f32 %v1344_v30, %v428_v17 }
 0x2b7   : > { %535 = vperm.xlu0 %1332, %v446_v15  }
 0x2bb   : > { %615 = vperm.xlu0 %1332, %v447_v46  }
 0x2bf   : > { %695 = vperm.xlu0 %1332, %v448_v48  }
 0x2c3   : > { %775 = vperm.xlu0 %1332, %v449_v5  }
 0x2c7   : > { %855 = vperm.xlu0 %1332, %v450_v18  }
 0x2cb   : > { %935 = vperm.xlu0 %1332, %v451_v21  }
 0x2cf   : > { %1015 = vperm.xlu0 %1332, %v452_v23  }
 0x332   : > { %v456_v24 = vpop.permute.xlu0 %455 }
 0x333   : > { %v460_v54 = vrot.slane %v456_v24, %v1613_v22 }
 0x335   : > { %1243 = vmatmul.mubr.msk.f32.vlgmr.msra.gmra.mrb[0].mxu0 %vm259_vm7, %v460_v54 }
 0x336   : > { %v536_v25 = vpop.permute.xlu0 %535  ;;  %1251 = vmatpush3.msra.mxu0 %v1588_v2  ;;  %1252 = vmatprep.mubr.msk.f32.mxu0 %vm1454_vm8, %v1453_v12 }
 0x337   : > { %v540_v61 = vrot.slane %v536_v25, %v1613_v22  ;;  %1260 = vmatprep.subr.mxu0 %v1453_v12 }
 0x339   : > { %1248 = vmatmul.mubr.msk.f32.vlgmr.msra.gmra.mrb[0].mxu1 %vm259_vm7, %v540_v61 }
 0x33a   : > { %v616_v19 = vpop.permute.xlu0 %615  ;;  %1256 = vmatpush3.msra.mxu1 %v1594_v6  ;;  %1257 = vmatprep.mubr.msk.f32.mxu1 %vm1454_vm8, %v1453_v12 }
 0x33b   : > { %v620_v3 = vrot.slane %v616_v19, %v1613_v22  ;;  %1265 = vmatprep.subr.mxu1 %v1453_v12 }
 0x33d   : > { %1253 = vmatmul.mubr.msk.f32.vlgmr.msra.gmra.mrb[2].mxu0 %vm259_vm7, %v620_v3 }
 0x33e   : > { %v696_v2 = vpop.permute.xlu0 %695  ;;  %1261 = vmatpush3.msra.mxu0 %v1598_v9  ;;  %1262 = vmatprep.mubr.msk.f32.mxu0 %vm1454_vm8, %v1453_v12 }
 0x33f   : > { %v700_v11 = vrot.slane %v696_v2, %v1613_v22  ;;  %1270 = vmatprep.subr.mxu0 %v1453_v12 }
 0x341   : > { %1258 = vmatmul.mubr.msk.f32.vlgmr.msra.gmra.mrb[2].mxu1 %vm259_vm7, %v700_v11 }
 0x342   : > { %v776_v6 = vpop.permute.xlu0 %775  ;;  %1266 = vmatpush3.msra.mxu1 %v1600_v10  ;;  %1267 = vmatprep.mubr.msk.f32.mxu1 %vm1454_vm8, %v1453_v12 }
 0x343   : > { %v780_v26 = vrot.slane %v776_v6, %v1613_v22  ;;  %1275 = vmatprep.subr.mxu1 %v1453_v12 }
 0x345   : > { %1263 = vmatmul.mubr.msk.f32.vlgmr.msra.gmra.mrb[4].mxu0 %vm259_vm7, %v780_v26 }
 0x346   : > { %v856_v9 = vpop.permute.xlu0 %855  ;;  %1271 = vmatpush3.msra.mxu0 %v1604_v13  ;;  %1272 = vmatprep.mubr.msk.f32.mxu0 %vm1454_vm8, %v1453_v12 }
 0x347   : > { %v860_v27 = vrot.slane %v856_v9, %v1613_v22 }
 0x349   : > { %1268 = vmatmul.mubr.msk.f32.vlgmr.msra.gmra.mrb[4].mxu1 %vm259_vm7, %v860_v27 }
 0x34a   : > { %v936_v10 = vpop.permute.xlu0 %935  ;;  %1276 = vmatpush3.msra.mxu1 %v1606_v14  ;;  %1277 = vmatprep.mubr.msk.f32.mxu1 %vm1454_vm8, %v1453_v12 }
 0x34b   : > { %v940_v28 = vrot.slane %v936_v10, %v1613_v22 }
 0x34d   : > { %1273 = vmatmul.mubr.msk.f32.vlgmr.msra.gmra.mrb[6].mxu0 %vm259_vm7, %v940_v28 }
 0x34e   : > { %v1016_v29 = vpop.permute.xlu0 %1015 }
 0x34f   : > { %v1020_v13 = vrot.slane %v1016_v29, %v1613_v22 }
 0x351   : > { %1278 = vmatmul.mubr.msk.f32.vlgmr.msra.gmra.mrb[6].mxu1 %vm259_vm7, %v1020_v13 }
 0x408   : > { %v529_v30 = vpop.f32.mrb[0].mxu0 }
 0x409   : > { %v1244_v31 = vpop.f32.mrb[1].mxu0 }
 0x40c   : > { %v609_v32 = vpop.f32.mrb[0].mxu1 }
 0x40d   : > { %v1101_v33 = vrot.slane %v609_v32, 7  ;;  %v1249_v34 = vpop.f32.mrb[1].mxu1 }
 0x40f   : > { %v1102_v35 = vsel %vm244_vm0, %v1101_v33, %v529_v30 }
 0x410   : > { %v689_v14 = vpop.f32.mrb[2].mxu0 }
 0x411   : > { %v1103_v36 = vrot.slane %v689_v14, 6  ;;  %v1254_v37 = vpop.f32.mrb[3].mxu0 }
 0x413   : > { %v1104_v38 = vsel %vm246_vm1, %v1103_v36, %v1102_v35 }
 0x414   : > { %v769_v39 = vpop.f32.mrb[2].mxu1 }
 0x415   : > { %v1105_v40 = vrot.slane %v769_v39, 5  ;;  %v1259_v41 = vpop.f32.mrb[3].mxu1 }
 0x417   : > { %v1106_v22 = vsel %vm248_vm2, %v1105_v40, %v1104_v38 }
 0x418   : > { %v849_v42 = vpop.f32.mrb[4].mxu0 }
 0x419   : > { %v1107_v43 = vrot.slane %v849_v42, 4  ;;  %v1264_v44 = vpop.f32.mrb[5].mxu0 }
 0x41b   : > { %v1108_v45 = vsel %vm250_vm3, %v1107_v43, %v1106_v22 }
 0x41c   : > { %v929_v50 = vpop.f32.mrb[4].mxu1 }
 0x41d   : > { %v1109_v51 = vrot.slane %v929_v50, 3  ;;  %v1269_v52 = vpop.f32.mrb[5].mxu1 }
 0x41f   : > { %v1110_v53 = vsel %vm252_vm4, %v1109_v51, %v1108_v45 }
 0x420   : > { %v1009_v55 = vpop.f32.mrb[6].mxu0 }
 0x421   : > { %v1111_v56 = vrot.slane %v1009_v55, 2  ;;  %v1274_v57 = vpop.f32.mrb[7].mxu0 }
 0x423   : > { %v1112_v58 = vsel %vm254_vm5, %v1111_v56, %v1110_v53 }
 0x424   : > { %v1089_v59 = vpop.f32.mrb[6].mxu1 }
 0x425   : > { %v1113_v60 = vrot.slane %v1089_v59, 1  ;;  %v1279_v62 = vpop.f32.mrb[7].mxu1 }
 0x427   : > { %v1114_v63 = vsel %vm256_vm6, %v1113_v60, %v1112_v58 }
 0x428   : > { %1116 = vst [vmem:[%s161_s4] sm:$0xff] %v1114_v63 }
 0x429   : > { %1394 = shalt.err (!%p1391_p2)
}
 0x42a   : > { %s1395_s25 = scalar_lea.hbm %s1750_s16, 128  ;;  %s1399_s29 = scalar_lea.hbm %s1797_s2, 256 }
 0x42b   : > { %p1396_p4 = scmp.ne.s32.totalorder %s1750_s16, %s1395_s25  ;;  %p1400_p9 = scmp.lt.u32.totalorder %s1750_s16, %s1797_s2 }
 0x42c   : > { %p1401_p1 = scmp.lt.u32.totalorder %s1399_s29, %s1395_s25  ;;  %p1403_p6 = scmp.lt.u32.totalorder %s1395_s25, %s1750_s16 }
 0x42d   : > { %p1397_p5 = pnand %p1396_p4, %p1804_p11 }
 0x42e   : > { %p1402_p3 = por %p1401_p1, %p1400_p9 }
 0x42f   : > { %p1398_p7 = pneg %p1397_p5 }
 0x430   : > { %p1404_p12 = por %p1403_p6, %p1402_p3 }
 0x432   : > { %p1405_p13 = pnand %p1404_p12, %p1398_p7 }
 0x434   : > { %1408 = shalt.err (!%p1405_p13)
}
 0x435   : > { %1282 = dma.vmem_to_hbm [thread:$0]  (%p1804_p11), %s1752_s7, 128, %s1750_s16, %s1118_s17  }
 0x436 PF: > { %s1143_s28 = sand.u32 1, %s1435_s9   ;;  %p1805_p8 = scmp.ne.s32.totalorder %s1802_s22, 0 }
 0x437   : > { %p1806_p10 = scmp.ge.s32.totalorder %s1447_s12, 2  ;;  %s1144_s30 = scalar_lea.sflag [#allocation4], %s1143_s28 }
 0x439   : > { %p1289_p0 = pnand %p1806_p10, %p1805_p8 }
 0x43b   : > { %1430 = dma.done.wait (!%p1289_p0), %s1144_s30, 128  }
 0x43c   : > { %1432 = vsyncadd (!%p1289_p0), %s1144_s30, 4294967168  ;;  %p15_p2 = scmp.ge.s32.totalorder %s1496_s15, 4   ;;  %s1807_s9 = smov %s1439_s10 }
 0x43d   : > { %s1808_s10 = smov %s1443_s11  ;;  %s1809_s11 = smov %s1508_s18 }
 0x43e   : > { %s1810_s12 = smov %s1496_s15  ;;  %17 = sbr.rel (!%p15_p2) target bundleno = 5 (0x5), region = 73 }
 0x445   :  { %1149 = vsyncpa [#allocation3], 1 }
 0x446   :  { %1151 = vsyncpa [#allocation3 + $0x1], 1 }
 0x447   :  { %1152 = vsyncpa [#allocation4], 1 }
 0x448   :  { %1154 = vsyncpa [#allocation4 + $0x1], 1 }

</bundles_post_ra>
